<compile_context>
chip_gen: v7x
topology: tpu7x:2x2x1
jax: 0.10.0
libtpu: 0.0.40
codegen_flags: <defaults>
</compile_context>

<pallas_src>
import jax
import jax.numpy as jnp
from jax.experimental import pallas as pl
from jax.experimental.pallas import tpu as pltpu

NUM_ITEMS = 2090
NUM_USERS = 50
HIDDEN_LAYERS = [16, 32, 16, 8]
GMF_EMB = 8
MLP_EMB = 8


def _round_up(x, m):
    return (x + m - 1) // m * m


# ---------------------------------------------------------------------------
# Packed-weight layout (single (64, 128) f32 buffer)
#   rows  0:32, cols  0:16  -> W1^T  (32,16)   (cols 0:8 = user half, 8:16 = item half)
#   rows 32:48, cols  0:32  -> W2^T  (16,32)
#   rows 48:56, cols  0:16  -> W3^T  ( 8,16)
#   rows  0:32, col  64     -> b1    (32, 1)
#   rows 32:48, col  64     -> b2    (16, 1)
#   rows 48:56, col  64     -> b3    ( 8, 1)
#   rows 48:56, col  65     -> Wout[0:8]  ( 8, 1)   (MLP half, as a column)
#   rows 48:56, col  66     -> Wout[8:16] ( 8, 1)   (GMF half, as a column)
#   row  48   , col  67     -> b_out (scalar)
# ---------------------------------------------------------------------------
def pack_weights(params):
    P = jnp.zeros((64, 128), jnp.float32)
    P = P.at[0:32, 0:16].set(params["w1"].T)
    P = P.at[32:48, 0:32].set(params["w2"].T)
    P = P.at[48:56, 0:16].set(params["w3"].T)
    P = P.at[0:32, 64:65].set(params["b1"].reshape(-1, 1))
    P = P.at[32:48, 64:65].set(params["b2"].reshape(-1, 1))
    P = P.at[48:56, 64:65].set(params["b3"].reshape(-1, 1))
    P = P.at[48:56, 65:66].set(params["wo"][0:8, :])
    P = P.at[48:56, 66:67].set(params["wo"][8:16, :])
    P = P.at[48:49, 67:68].set(params["bo"].reshape(1, 1))
    return P


# ---------------------------------------------------------------------------
# Stacked-activation layout: one (32, Bp) bf16 array, batch on the lane axis.
#   rows  0: 8 -> mlp user embedding^T
#   rows  8:16 -> mlp item embedding^T
#   rows 16:24 -> gmf user embedding^T
#   rows 24:32 -> gmf item embedding^T
# ---------------------------------------------------------------------------
def neucf_kernel(x_ref, w_ref, out_ref):
    # Upcast once: elementwise / matmul work is done in f32 (v5e VPU has no
    # bf16), the HBM savings come from the bf16 DMA of the (32, bm) tile.
    x = x_ref[...].astype(jnp.float32)        # (32, bm)

    # ---- MLP tower: 16 -> 32 -> 16 -> 8, ReLU after each layer (W^T @ x) ----
    w1t = w_ref[0:32, 0:16]                   # (32, 16)
    b1 = w_ref[0:32, 64:65]                   # (32, 1)
    h = jnp.maximum(
        jnp.dot(w1t, x[0:16, :], preferred_element_type=jnp.float32) + b1, 0.0)

    w2t = w_ref[32:48, 0:32]                  # (16, 32)
    b2 = w_ref[32:48, 64:65]                  # (16, 1)
    h = jnp.maximum(
        jnp.dot(w2t, h, preferred_element_type=jnp.float32) + b2, 0.0)

    w3t = w_ref[48:56, 0:16]                  # (8, 16)
    b3 = w_ref[48:56, 64:65]                  # (8, 1)
    h = jnp.maximum(
        jnp.dot(w3t, h, preferred_element_type=jnp.float32) + b3, 0.0)  # (8, bm)

    # ---- GMF tower: elementwise product of GMF embeddings ----
    g = x[16:24, :] * x[24:32, :]             # (8, bm)

    # ---- Output layer as VPU multiply + sublane reduce (no N=1 matmuls) ----
    wo_mlp = w_ref[48:56, 65:66]              # (8, 1)
    wo_gmf = w_ref[48:56, 66:67]              # (8, 1)
    bo = w_ref[48:49, 67:68]                  # (1, 1)
    logits = (jnp.sum(h * wo_mlp, axis=0, keepdims=True)
              + jnp.sum(g * wo_gmf, axis=0, keepdims=True)
              + bo)                           # (1, bm) -- lane-dense output tile
    out_ref[...] = jax.nn.sigmoid(logits)


def neucf_forward(params, user_indices, item_indices, *, bm=4096):
    """NeuCF forward. user_indices/item_indices: int32 (B,). Returns (B, 1) f32."""
    B = user_indices.shape[0]

    # Pad batch to a lane-friendly size; keep bm a multiple of 128.
    Bp0 = _round_up(B, 128)
    bm = max(128, _round_up(min(bm, Bp0), 128))
    # Enforce >= 2 grid steps whenever possible so both v7x TensorCores get
    # work under dimension_semantics=("parallel",). (No down-tiling for v7x's
    # 64 MiB VMEM is needed: footprint is < ~1 MB even at bm=8192.)
    if Bp0 > 128 and Bp0 // bm < 2:
        bm = _round_up(pl.cdiv(Bp0, 2), 128)
    Bp = _round_up(Bp0, bm)

    pad = Bp - B
    u = jnp.pad(user_indices, (0, pad))       # pad with index 0 (valid row)
    it = jnp.pad(item_indices, (0, pad))

    # Embedding lookups (gather) are glue in plain JAX; stack all four
    # embeddings into one (32, Bp) bf16 array with batch on the lane axis so
    # the kernel does a single, half-width DMA per tile.
    # TODO(synk): fusing the gather in-kernel (tables fit in VMEM, indices via
    # scalar prefetch) would avoid the HBM round-trip of the gathered
    # activations entirely, but in-kernel dynamic row gather is left out here
    # for lowering robustness.
    xu = jnp.take(params["mlp_user_emb"], u, axis=0)     # (Bp, 8)
    xi = jnp.take(params["mlp_item_emb"], it, axis=0)    # (Bp, 8)
    gu = jnp.take(params["gmf_user_emb"], u, axis=0)     # (Bp, 8)
    gi = jnp.take(params["gmf_item_emb"], it, axis=0)    # (Bp, 8)
    x = jnp.concatenate([xu, xi, gu, gi], axis=1).T.astype(jnp.bfloat16)  # (32, Bp)

    P = pack_weights(params)                              # (64, 128) f32

    out = pl.pallas_call(
        neucf_kernel,
        out_shape=jax.ShapeDtypeStruct((1, Bp), jnp.float32),
        grid_spec=pltpu.PrefetchScalarGridSpec(
            num_scalar_prefetch=0,
            grid=(Bp // bm,),
            in_specs=[
                pl.BlockSpec((4 * MLP_EMB, bm), lambda i: (0, i)),  # stacked emb^T (bf16)
                pl.BlockSpec((64, 128), lambda i: (0, 0)),          # packed weights
            ],
            out_specs=pl.BlockSpec((1, bm), lambda i: (0, i)),      # lane-dense out
        ),
        compiler_params=pltpu.CompilerParams(
            dimension_semantics=("parallel",)),
    )(x, P)

    return out[:, :B].reshape(B, 1)


def init_params(key):
    """Deterministic parameter init (shapes match the PyTorch module)."""
    ks = jax.random.split(key, 12)

    def linear(kw, kb, fan_in, fan_out):
        bound = 1.0 / jnp.sqrt(fan_in)
        w = jax.random.uniform(kw, (fan_in, fan_out), jnp.float32, -bound, bound)
        b = jax.random.uniform(kb, (1, fan_out), jnp.float32, -bound, bound)
        return w, b

    w1, b1 = linear(ks[0], ks[1], HIDDEN_LAYERS[0], HIDDEN_LAYERS[1])   # 16 -> 32
    w2, b2 = linear(ks[2], ks[3], HIDDEN_LAYERS[1], HIDDEN_LAYERS[2])   # 32 -> 16
    w3, b3 = linear(ks[4], ks[5], HIDDEN_LAYERS[2], HIDDEN_LAYERS[3])   # 16 -> 8
    wo, bo = linear(ks[6], ks[7], HIDDEN_LAYERS[-1] + GMF_EMB, 1)       # 16 -> 1

    return {
        "mlp_user_emb": jax.random.normal(ks[8], (NUM_USERS, MLP_EMB), jnp.float32),
        "mlp_item_emb": jax.random.normal(ks[9], (NUM_ITEMS, MLP_EMB), jnp.float32),
        "gmf_user_emb": jax.random.normal(ks[10], (NUM_USERS, GMF_EMB), jnp.float32),
        "gmf_item_emb": jax.random.normal(ks[11], (NUM_ITEMS, GMF_EMB), jnp.float32),
        "w1": w1, "b1": b1, "w2": w2, "b2": b2, "w3": w3, "b3": b3,
        "wo": wo, "bo": bo,
    }


def neucf_reference(params, user_indices, item_indices, *, emb_dtype=jnp.float32):
    """Pure-JAX reference of the PyTorch forward, for correctness checking.

    With emb_dtype=bfloat16 the embeddings are cast exactly as the kernel's
    wrapper does, giving a numerically tight comparison.
    """
    def take(tbl, idx):
        return jnp.take(tbl, idx, axis=0).astype(emb_dtype).astype(jnp.float32)

    mlp_u = take(params["mlp_user_emb"], user_indices)
    mlp_i = take(params["mlp_item_emb"], item_indices)
    gmf_u = take(params["gmf_user_emb"], user_indices)
    gmf_i = take(params["gmf_item_emb"], item_indices)
    x = jnp.concatenate([mlp_u, mlp_i], axis=-1)
    x = jax.nn.relu(x @ params["w1"] + params["b1"])
    x = jax.nn.relu(x @ params["w2"] + params["b2"])
    x = jax.nn.relu(x @ params["w3"] + params["b3"])
    g = gmf_u * gmf_i
    combined = jnp.concatenate([x, g], axis=-1)
    return jax.nn.sigmoid(combined @ params["wo"] + params["bo"])


if __name__ == "__main__":
    key = jax.random.PRNGKey(0)
    kp, ku, ki, ku2, ki2 = jax.random.split(key, 5)

    params = init_params(kp)

    # --- small-batch test (single grid step) ---
    B = 64
    user_indices = jax.random.randint(ku, (B,), 0, NUM_USERS, dtype=jnp.int32)
    item_indices = jax.random.randint(ki, (B,), 0, NUM_ITEMS, dtype=jnp.int32)

    out = neucf_forward(params, user_indices, item_indices)
    out = jax.block_until_ready(out)
    assert out.shape == (B, 1), out.shape

    # Tight check vs a bf16-consistent reference (same embedding cast as kernel).
    ref_bf16 = neucf_reference(params, user_indices, item_indices,
                               emb_dtype=jnp.bfloat16)
    assert jnp.allclose(out, ref_bf16, atol=1e-4, rtol=1e-4), "mismatch vs bf16 reference"

    # Loose check vs the full-f32 PyTorch-equivalent reference (bf16 input cast).
    ref_f32 = neucf_reference(params, user_indices, item_indices)
    assert jnp.max(jnp.abs(out - ref_f32)) < 5e-2, "mismatch vs f32 reference"

    # --- medium-batch test (exercises >=2 grid steps + in-block padding) ---
    B2 = 300
    u2 = jax.random.randint(ku2, (B2,), 0, NUM_USERS, dtype=jnp.int32)
    i2 = jax.random.randint(ki2, (B2,), 0, NUM_ITEMS, dtype=jnp.int32)
    out2 = jax.block_until_ready(neucf_forward(params, u2, i2))
    assert out2.shape == (B2, 1), out2.shape
    ref2 = neucf_reference(params, u2, i2, emb_dtype=jnp.bfloat16)
    assert jnp.allclose(out2, ref2, atol=1e-4, rtol=1e-4), "mismatch vs bf16 reference (B=300)"

    print("KERNEL_OK")
</pallas_src>

<mosaic_0001>
module attributes {stable_mosaic.version = 11 : i64} {
  func.func @neucf_kernel(%arg0: i32, %arg1: memref<32x128xbf16, #tpu.memory_space<vmem>>, %arg2: memref<64x128xf32, #tpu.memory_space<vmem>>, %arg3: memref<1x128xf32, #tpu.memory_space<vmem>>) attributes {dimension_semantics = [#tpu.dimension_semantics<parallel>], iteration_bounds = array<i64: 1>, scalar_prefetch = 0 : i64, scratch_operands = 0 : i64, tpu.core_type = #tpu.core_type<tc>, window_params = [{transform_indices = @transform_0, window_bounds = array<i64: 32, 128>}, {pipeline_mode = #tpu.pipeline_mode<synchronous>, transform_indices = @transform_1, window_bounds = array<i64: 64, 128>}, {transform_indices = @transform_2, window_bounds = array<i64: 1, 128>}]} {
    %c0 = arith.constant 0 : index
    %c0_0 = arith.constant 0 : index
    %0 = vector.load %arg1[%c0, %c0_0] : memref<32x128xbf16, #tpu.memory_space<vmem>>, vector<32x128xbf16>
    %1 = arith.extf %0 : vector<32x128xbf16> to vector<32x128xf32>
    %c0_1 = arith.constant 0 : index
    %c0_2 = arith.constant 0 : index
    %2 = vector.load %arg2[%c0_1, %c0_2] : memref<64x128xf32, #tpu.memory_space<vmem>>, vector<32x16xf32>
    %c0_3 = arith.constant 0 : index
    %c64 = arith.constant 64 : index
    %3 = vector.load %arg2[%c0_3, %c64] : memref<64x128xf32, #tpu.memory_space<vmem>>, vector<32x1xf32>
    %4 = vector.extract_strided_slice %1 {offsets = [0, 0], sizes = [16, 128], strides = [1, 1]} : vector<32x128xf32> to vector<16x128xf32>
    %cst = arith.constant dense<0.000000e+00> : vector<32x128xf32>
    %5 = tpu.matmul %2, %4, %cst {dimension_numbers = #tpu.dot_dimension_numbers<[1], [0], [0], [1], [0, 0, 1, 1], [], []>} : vector<32x16xf32>, vector<16x128xf32>, vector<32x128xf32> -> vector<32x128xf32>
    %6 = vector.broadcast %3 : vector<32x1xf32> to vector<32x128xf32>
    %7 = arith.addf %5, %6 : vector<32x128xf32>
    %cst_4 = arith.constant 0.000000e+00 : f32
    %8 = vector.broadcast %cst_4 : f32 to vector<32x128xf32>
    %9 = arith.maximumf %7, %8 : vector<32x128xf32>
    %c32 = arith.constant 32 : index
    %c0_5 = arith.constant 0 : index
    %10 = vector.load %arg2[%c32, %c0_5] : memref<64x128xf32, #tpu.memory_space<vmem>>, vector<16x32xf32>
    %c32_6 = arith.constant 32 : index
    %c64_7 = arith.constant 64 : index
    %11 = vector.load %arg2[%c32_6, %c64_7] : memref<64x128xf32, #tpu.memory_space<vmem>>, vector<16x1xf32>
    %cst_8 = arith.constant dense<0.000000e+00> : vector<16x128xf32>
    %12 = tpu.matmul %10, %9, %cst_8 {dimension_numbers = #tpu.dot_dimension_numbers<[1], [0], [0], [1], [0, 0, 1, 1], [], []>} : vector<16x32xf32>, vector<32x128xf32>, vector<16x128xf32> -> vector<16x128xf32>
    %13 = vector.broadcast %11 : vector<16x1xf32> to vector<16x128xf32>
    %14 = arith.addf %12, %13 : vector<16x128xf32>
    %cst_9 = arith.constant 0.000000e+00 : f32
    %15 = vector.broadcast %cst_9 : f32 to vector<16x128xf32>
    %16 = arith.maximumf %14, %15 : vector<16x128xf32>
    %c48 = arith.constant 48 : index
    %c0_10 = arith.constant 0 : index
    %17 = vector.load %arg2[%c48, %c0_10] : memref<64x128xf32, #tpu.memory_space<vmem>>, vector<8x16xf32>
    %c48_11 = arith.constant 48 : index
    %c64_12 = arith.constant 64 : index
    %18 = vector.load %arg2[%c48_11, %c64_12] : memref<64x128xf32, #tpu.memory_space<vmem>>, vector<8x1xf32>
    %cst_13 = arith.constant dense<0.000000e+00> : vector<8x128xf32>
    %19 = tpu.matmul %17, %16, %cst_13 {dimension_numbers = #tpu.dot_dimension_numbers<[1], [0], [0], [1], [0, 0, 1, 1], [], []>} : vector<8x16xf32>, vector<16x128xf32>, vector<8x128xf32> -> vector<8x128xf32>
    %20 = vector.broadcast %18 : vector<8x1xf32> to vector<8x128xf32>
    %21 = arith.addf %19, %20 : vector<8x128xf32>
    %cst_14 = arith.constant 0.000000e+00 : f32
    %22 = vector.broadcast %cst_14 : f32 to vector<8x128xf32>
    %23 = arith.maximumf %21, %22 : vector<8x128xf32>
    %24 = vector.extract_strided_slice %1 {offsets = [16, 0], sizes = [8, 128], strides = [1, 1]} : vector<32x128xf32> to vector<8x128xf32>
    %25 = vector.extract_strided_slice %1 {offsets = [24, 0], sizes = [8, 128], strides = [1, 1]} : vector<32x128xf32> to vector<8x128xf32>
    %26 = arith.mulf %24, %25 : vector<8x128xf32>
    %c48_15 = arith.constant 48 : index
    %c65 = arith.constant 65 : index
    %27 = vector.load %arg2[%c48_15, %c65] : memref<64x128xf32, #tpu.memory_space<vmem>>, vector<8x1xf32>
    %c48_16 = arith.constant 48 : index
    %c66 = arith.constant 66 : index
    %28 = vector.load %arg2[%c48_16, %c66] : memref<64x128xf32, #tpu.memory_space<vmem>>, vector<8x1xf32>
    %c48_17 = arith.constant 48 : index
    %c67 = arith.constant 67 : index
    %29 = vector.load %arg2[%c48_17, %c67] : memref<64x128xf32, #tpu.memory_space<vmem>>, vector<1x1xf32>
    %30 = vector.broadcast %27 : vector<8x1xf32> to vector<8x128xf32>
    %31 = arith.mulf %23, %30 : vector<8x128xf32>
    %cst_18 = arith.constant dense<0.000000e+00> : vector<128xf32>
    %32 = vector.multi_reduction <add>, %31, %cst_18 [0] : vector<8x128xf32> to vector<128xf32>
    %33 = vector.shape_cast %32 : vector<128xf32> to vector<1x128xf32>
    %34 = vector.broadcast %28 : vector<8x1xf32> to vector<8x128xf32>
    %35 = arith.mulf %26, %34 : vector<8x128xf32>
    %cst_19 = arith.constant dense<0.000000e+00> : vector<128xf32>
    %36 = vector.multi_reduction <add>, %35, %cst_19 [0] : vector<8x128xf32> to vector<128xf32>
    %37 = vector.shape_cast %36 : vector<128xf32> to vector<1x128xf32>
    %38 = arith.addf %33, %37 : vector<1x128xf32>
    %39 = vector.broadcast %29 : vector<1x1xf32> to vector<1x128xf32>
    %40 = arith.addf %38, %39 : vector<1x128xf32>
    %41 = arith.negf %40 : vector<1x128xf32>
    %42 = math.exp %41 : vector<1x128xf32>
    %cst_20 = arith.constant 1.000000e+00 : f32
    %43 = vector.broadcast %cst_20 : f32 to vector<1x128xf32>
    %44 = arith.addf %43, %42 : vector<1x128xf32>
    %45 = arith.divf %43, %44 : vector<1x128xf32>
    %c0_21 = arith.constant 0 : index
    %c0_22 = arith.constant 0 : index
    %46 = vector.load %arg3[%c0_21, %c0_22] : memref<1x128xf32, #tpu.memory_space<vmem>>, vector<1x128xf32>
    tpu.vector_store %arg3[%c0_21, %c0_22], %45 {strides = array<i32>} : memref<1x128xf32, #tpu.memory_space<vmem>>, vector<1x128xf32>,
    return
  }
  func.func @transform_0(%arg0: i32) -> (i32, i32) {
    %c0_i32 = arith.constant 0 : i32
    %c0_i32_0 = arith.constant 0 : i32
    return %c0_i32, %arg0 : i32, i32
  }
  func.func @transform_1(%arg0: i32) -> (i32, i32) {
    %c0_i32 = arith.constant 0 : i32
    %c0_i32_0 = arith.constant 0 : i32
    %c0_i32_1 = arith.constant 0 : i32
    return %c0_i32, %c0_i32_0 : i32, i32
  }
  func.func @transform_2(%arg0: i32) -> (i32, i32) {
    %c0_i32 = arith.constant 0 : i32
    %c0_i32_0 = arith.constant 0 : i32
    return %c0_i32, %arg0 : i32, i32
  }
}

</mosaic_0001>

<bundles_post_ra>
// kernel: tpu_custom_call.1
= control target key start
LH: loop header
LB: loop body
LE: loop exit
PB: predicated region body
PF: predicated region fallthrough
CT: control target
= control target key end

     0   :  { %7 = vsyncpa [#allocation3], 0  ;;  %s640_s0 = inlined_call_operand.hbm [shape: bf16[32,128], index: 0, kind: input, shape index: {}]   ;;  %s641_s1 = inlined_call_operand.hbm [shape: f32[64,128], index: 1, kind: input, shape index: {}]   ;;  %s642_s2 = inlined_call_operand.hbm [shape: f32[1,128], index: 2, kind: output, shape index: {}]  }
   0x1   :  { %8 = vsyncpa [#allocation6], 0 }
   0x2   :  { %9 = vsyncpa [#allocation4], 0  ;;  %s568_s9 = smov [#allocation2]   ;;  %s496_s13 = scalar_lea.hbm %s640_s0, 256 }
   0x3   :  { %s15_s10 = sshll.u32 %s568_s9, 4  ;;  %p497_p0 = scmp.ne.s32.totalorder %s640_s0, %s496_s13  ;;  %s16_s10 = int_to_ptr.vmem [resolvable:$true] %s15_s10 }
   0x4   :  { %p500_p1 = scmp.lt.u32.totalorder %s496_s13, %s640_s0 }
   0x6   :  { %p502_p2 = pnand %p500_p1, %p497_p0 }
   0x8   :  { %505 = shalt.err (!%p502_p2)
}
   0x9   :  { %s506_s18 = scalar_lea.vmem %s16_s10, 256  ;;  %p511_p4 = scmp.lt.s32.totalorder %s16_s10, %s16_s10 }
   0xa   :  { %p507_p3 = scmp.ne.s32.totalorder %s16_s10, %s506_s18  ;;  %p512_p5 = scmp.lt.s32.totalorder %s506_s18, %s506_s18 }
   0xc   :  { %p513_p6 = por %p512_p5, %p511_p4 }
   0xe   :  { %p514_p7 = pnand %p513_p6, %p507_p3 }
  0x10   :  { %517 = shalt.err (!%p514_p7)
}
  0x11   :  { %s569_s19 = smov 64   ;;  %s570_s20 = smov 4  }
  0x12   :  { %21 = dma.hbm_to_vmem [thread:$0]  %s640_s0, 256, %s16_s10, [#allocation3], %s569_s19, %s569_s19, %s570_s20  }
  0x13   :  { %s571_s23 = smov [#allocation5]   ;;  %s518_s27 = scalar_lea.hbm %s641_s1, 1024 }
  0x14   :  { %s27_s24 = sshll.u32 %s571_s23, 4  ;;  %p519_p8 = scmp.ne.s32.totalorder %s641_s1, %s518_s27  ;;  %s28_s24 = int_to_ptr.vmem [resolvable:$true] %s27_s24 }
  0x15   :  { %p522_p9 = scmp.lt.u32.totalorder %s518_s27, %s641_s1 }
  0x17   :  { %p524_p10 = pnand %p522_p9, %p519_p8 }
  0x19   :  { %527 = shalt.err (!%p524_p10)
}
  0x1a   :  { %s528_s4 = scalar_lea.vmem %s28_s24, 1024  ;;  %p533_p12 = scmp.lt.s32.totalorder %s28_s24, %s28_s24 }
  0x1b   :  { %p529_p11 = scmp.ne.s32.totalorder %s28_s24, %s528_s4  ;;  %p534_p13 = scmp.lt.s32.totalorder %s528_s4, %s528_s4 }
  0x1d   :  { %p535_p0 = por %p534_p13, %p533_p12 }
  0x1f   :  { %p536_p1 = pnand %p535_p0, %p529_p11 }
  0x21   :  { %539 = shalt.err (!%p536_p1)
}
  0x22   :  { %s572_s0 = smov 128   ;;  %s573_s5 = smov 8  }
  0x23   :  { %33 = dma.hbm_to_vmem [thread:$0]  %s641_s1, 1024, %s28_s24, [#allocation6], %s572_s0, %s572_s0, %s573_s5  }
  0x24   :  { %562 = dma.done.wait [#allocation3], 256  }
  0x25   :  { %563 = vsyncadd [#allocation3], 4294967040 }
  0x26   :  { %564 = dma.done.wait [#allocation6], 1024  }
  0x27   :  { %565 = vsyncadd [#allocation6], 4294966272  ;;  %v574_v0 = vmov 64   ;;  %vm72_vm0 = vcmask 130048   ;;  %v406_v1 = vld [vmem:[#allocation2] sm:$0xff]   ;;  %v48_v2 = vld [vmem:[#allocation5] sm:$0xff] }
  0x28   :  { %486 = vset.pattern.permute.xlu0 %v574_v0  ;;  %487 = vset.pattern.permute.xlu1 %v574_v0  ;;  %v49_v3 = vld [vmem:[#allocation5 + $0x8] sm:$0xff]  ;;  %v50_v4 = vld [vmem:[#allocation5 + $0x10] sm:$0xff]  ;;  %v51_v5 = vld [vmem:[#allocation5 + $0x18] sm:$0xff]  ;;  %vm182_vm1 = vcmask 261120   ;;  %v575_v27 = vmov 0.0|0.0   ;;  %vm576_vm2 = vmmov 0  }
  0x29   :  { %458 = vmatprep.subr.bf16.mxu0 %v406_v1  ;;  %433 = vmatprep.mubr.msk.f32.mxu0 %vm72_vm0, %v48_v2  ;;  %v170_v6 = vld [vmem:[#allocation5 + $0x20] sm:$0xff]  ;;  %v171_v7 = vld [vmem:[#allocation5 + $0x28] sm:$0xff]  ;;  %v264_v8 = vld [vmem:[#allocation5 + $0x30] sm:$0xff]  ;;  %v577_v28 = vmov 0.0   ;;  %v578_v29 = vmov 66   ;;  %v579_v30 = vmov 65  }
  0x2a   :  { %460 = vmatpush3.bf16.msra.mxu0 %v406_v1  ;;  %54 = vperm.xlu0 %486, %v48_v2   ;;  %v344_v31 = vld [vmem:[#allocation5 + $0x30] sm:$0x1]  ;;  %v580_v32 = vmov 67   ;;  %v413_v42 = vld [vmem:[#allocation2 + $0x8] sm:$0xff]   ;;  %s581_s1 = smov [#allocation7]  }
  0x2b   :  { %64 = vperm.xlu1 %487, %v50_v4   ;;  %447 = vmatprep.mubr.msk.f32.mxu1 %vm182_vm1, %v170_v6  ;;  %v411_v43 = vunpack.c.l.bf16 %v413_v42  ;;  %v412_v44 = vunpack.c.h.bf16 %v413_v42  ;;  %s387_s8 = sshll.u32 %s581_s1, 4  ;;  %s388_s8 = int_to_ptr.vmem [resolvable:$true] %s387_s8 }
  0x2c   :  { %469 = vmatprep.subr.bf16.mxu0 %v575_v27  ;;  %s540_s9 = scalar_lea.vmem %s388_s8, 16  ;;  %s544_s10 = scalar_lea.vmem %s388_s8, 32 }
  0x2d   :  { %434 = vmatmul.mubr.msk.f32.vlgmr.msra.gmra.mrb[0].mxu0 %vm72_vm0, %v49_v3  ;;  %v343_v46 = vmul.f32 %v412_v44, %v411_v43  ;;  %p541_p2 = scmp.ne.s32.totalorder %s388_s8, %s540_s9  ;;  %p545_p3 = scmp.lt.s32.totalorder %s388_s8, %s388_s8 }
  0x2e   :  { %436 = vmatprep.mubr.msk.f32.mxu0 %vm72_vm0, %v50_v4  ;;  %59 = vperm.xlu0 %486, %v49_v3   ;;  %p546_p4 = scmp.lt.s32.totalorder %s544_s10, %s540_s9 }
  0x2f   :  { %69 = vperm.xlu1 %487, %v51_v5  }
  0x30   :  { %p547_p5 = por %p546_p4, %p545_p3 }
  0x31   :  { %437 = vmatmul.mubr.msk.f32.gmra.mrb[2].mxu0 %vm72_vm0, %v51_v5 }
  0x32   :  { %174 = vperm.xlu0 %486, %v170_v6   ;;  %454 = vmatprep.mubr.msk.f32.mxu0 %vm576_vm2, %v577_v28  ;;  %p548_p6 = pnand %p547_p5, %p541_p2 }
  0x33   :  { %179 = vperm.xlu1 %487, %v171_v7  }
  0x36   :  { %267 = vperm.xlu0 %486, %v264_v8  }
  0x37   :  { %488 = vset.pattern.permute.xlu1 %v579_v30 }
  0x38   :  { %346 = vperm.xlu1 %488, %v264_v8  }
  0x3a   :  { %489 = vset.pattern.permute.xlu0 %v578_v29 }
  0x3b   :  { %357 = vperm.xlu0 %489, %v264_v8  }
  0x3c   :  { %490 = vset.pattern.permute.xlu1 %v580_v32 }
  0x3d   :  { %370 = vperm.xlu1 %490, %v344_v31  }
  0x3f   :  { %491 = vset.pattern.permute.xlu0 %v580_v32 }
  0xa9   :  { %v55_v9 = vpop.permute.xlu0 %54 }
  0xaa   :  { %v65_v10 = vpop.permute.xlu1 %64 }
  0xad   :  { %v60_v11 = vpop.permute.xlu0 %59 }
  0xae   :  { %v70_v17 = vpop.permute.xlu1 %69 }
  0xb1   :  { %v175_v35 = vpop.permute.xlu0 %174 }
  0xb2   :  { %v180_v33 = vpop.permute.xlu1 %179 }
  0xb5   :  { %v268_v45 = vpop.permute.xlu0 %267 }
  0xb7   :  { %v347_v54 = vpop.permute.xlu1 %346 }
  0xba   :  { %v358_v47 = vpop.permute.xlu0 %357 }
  0xbb   :  { %v360_v48 = vmul.f32 %v358_v47, %v343_v46 }
  0xbc   :  { %v371_v3 = vpop.permute.xlu1 %370 }
  0xbd   :  { %v361_v49 = vrot.slane %v360_v48, 4 }
  0xbf   :  { %v362_v52 = vadd.f32 %v361_v49, %v360_v48 }
  0xc1   :  { %v363_v56 = vrot.slane %v362_v52, 2 }
  0xc3   :  { %v364_v59 = vadd.f32 %v363_v56, %v362_v52 }
  0xc5   :  { %v365_v63 = vrot.slane %v364_v59, 1 }
  0xc7   :  { %v366_v2 = vadd.f32 %v365_v63, %v364_v59 }
 0x100   :  { %v435_v12 = vpop.f32.mrb[0].mxu0 }
 0x101   :  { %v153_v13 = vadd.f32 %v435_v12, %v60_v11  ;;  %v147_v14 = vpop.f32.mrb[1].mxu0 }
 0x102   :  { %v148_v15 = vadd.f32 %v147_v14, %v55_v9 }
 0x103   :  { %v167_v16 = vmax.f32 %v153_v13, 0.0 }
 0x104   :  { %v166_v18 = vmax.f32 %v148_v15, 0.0  ;;  %v438_v19 = vpop.f32.mrb[2].mxu0 }
 0x105   :  { %v163_v20 = vadd.f32 %v438_v19, %v70_v17  ;;  %v157_v21 = vpop.f32.mrb[3].mxu0 }
 0x106   :  { %v158_v22 = vadd.f32 %v157_v21, %v65_v10  ;;  %v461_v23 = vpack.c.bf16 %v167_v16, %v166_v18 }
 0x107   :  { %v169_v24 = vmax.f32 %v163_v20, 0.0 }
 0x108   :  { %v168_v25 = vmax.f32 %v158_v22, 0.0  ;;  %462 = vmatprep.subr.bf16.mxu1 %v461_v23 }
 0x109   :  { %464 = vmatpush3.bf16.msra.mxu1 %v461_v23 }
 0x10a   :  { %v465_v26 = vpack.c.bf16 %v169_v24, %v168_v25 }
 0x10c   :  { %466 = vmatprep.subr.bf16.mxu1 %v465_v26 }
 0x10d   :  { %468 = vmatpush3.bf16.msra.mxu1 %v465_v26 }
 0x110   :  { %448 = vmatmul.mubr.msk.f32.vlgmr.msra.gmra.mrb[0].mxu1 %vm182_vm1, %v171_v7 }
 0x1e3   :  { %v449_v34 = vpop.f32.mrb[0].mxu1 }
 0x1e4   :  { %v259_v36 = vadd.f32 %v449_v34, %v180_v33  ;;  %v253_v37 = vpop.f32.mrb[1].mxu1 }
 0x1e5   :  { %v254_v38 = vadd.f32 %v253_v37, %v175_v35 }
 0x1e6   :  { %v263_v39 = vmax.f32 %v259_v36, 0.0 }
 0x1e7   :  { %v262_v40 = vmax.f32 %v254_v38, 0.0 }
 0x1e9   :  { %v470_v41 = vpack.c.bf16 %v263_v39, %v262_v40 }
 0x1eb   :  { %471 = vmatpush3.bf16.msra.mxu0 %v470_v41 }
 0x1ee   :  { %455 = vmatmul.mubr.msk.f32.vlgmr.msra.gmra.mrb[4].mxu0 %vm72_vm0, %v264_v8 }
 0x2c1   :  { %v338_v50 = vpop.f32.mrb[4].mxu0 }
 0x2c2   :  { %v339_v51 = vadd.f32 %v338_v50, %v268_v45  ;;  %v456_v53 = vpop.f32.mrb[5].mxu0 }
 0x2c4   :  { %v342_v55 = vmax.f32 %v339_v51, 0.0 }
 0x2c6   :  { %v349_v57 = vmul.f32 %v347_v54, %v342_v55 }
 0x2c8   :  { %v350_v58 = vrot.slane %v349_v57, 4 }
 0x2ca   :  { %v351_v60 = vadd.f32 %v350_v58, %v349_v57 }
 0x2cc   :  { %v352_v61 = vrot.slane %v351_v60, 2 }
 0x2ce   :  { %v353_v62 = vadd.f32 %v352_v61, %v351_v60 }
 0x2d0   :  { %v354_v0 = vrot.slane %v353_v62, 1 }
 0x2d2   :  { %v355_v1 = vadd.f32 %v354_v0, %v353_v62 }
 0x2d4   :  { %v367_v4 = vadd.f32 %v366_v2, %v355_v1 }
 0x2d6   :  { %v373_v5 = vadd.f32 %v371_v3, %v367_v4 }
 0x2d8   :  { %v404_v6 = vmul.f32 -1.442695, %v373_v5 }
 0x2da   :  { %492 = vpow2.f32 %v404_v6 }
 0x2e4   :  { %v493_v7 = vpop.eup %492 }
 0x2e5   :  { %v377_v8 = vadd.f32 1.0, %v493_v7 }
 0x2e7   :  { %494 = vrcp.f32 %v377_v8 }
 0x2f1   :  { %v495_v9 = vpop.eup %494 }
 0x2f2   :  { %380 = vst [vmem:[#allocation7] sm:$0x1] %v495_v9 }
 0x2f3   :  { %551 = shalt.err (!%p548_p6)
}
 0x2f4   :  { %s552_s13 = scalar_lea.hbm %s642_s2, 16 }
 0x2f5   :  { %p553_p7 = scmp.ne.s32.totalorder %s642_s2, %s552_s13  ;;  %p556_p8 = scmp.lt.u32.totalorder %s552_s13, %s642_s2 }
 0x2f7   :  { %p558_p9 = pnand %p556_p8, %p553_p7 }
 0x2f9   :  { %561 = shalt.err (!%p558_p9)
}
 0x2fa   :  { %390 = dma.vmem_to_hbm [thread:$0]  %s388_s8, 16, %s642_s2, [#allocation4]  }
 0x2fb   :  { %566 = dma.done.wait [#allocation4], 16  }
 0x2fc   :  { %567 = vsyncadd [#allocation4], 4294967280 }
 0x2fd   :  { %394 = vsyncpa [#allocation3], 1 }
 0x2fe   :  { %395 = vsyncpa [#allocation6], 1 }
 0x2ff   :  { %396 = vsyncpa [#allocation4], 1 }

</bundles_post_ra>
